<compile_context>
chip_gen: v6e
topology: v6e:2x2x1
jax: 0.10.0
libtpu: 0.0.40
codegen_flags: <defaults>
</compile_context>

<pallas_src>
import functools
import math

import jax
import jax.numpy as jnp
from jax.experimental import pallas as pl
from jax.experimental.pallas import tpu as pltpu

EPS = 1e-5  # BatchNorm1d and LayerNorm default eps in PyTorch


def _round_up(x, m):
    return ((x + m - 1) // m) * m


# ----------------------------------------------------------------------------
# Kernel
# ----------------------------------------------------------------------------
def critic_kernel(sa_ref, wbd_ref, w2s_ref, pk_ref, out_ref, *,
                  n_valid, n_pad, h_dim, out_col0):
    # ---- hoisted single read of the packed small-parameter slab (f32) ----
    pk = pk_ref[...]
    bn_g, bn_b = pk[0:1, :], pk[1:2, :]
    ln_g, ln_b = pk[2:3, :], pk[3:4, :]
    b2 = pk[4:5, :]
    w3_row = pk[5:6, :]          # fc3 weight as a row vector
    b3 = pk[6:7, 0:1]            # fc3 bias (scalar)

    sa = sa_ref[...]             # bf16 [Bp, s_pad + a_pad]

    # ---- fused block-diagonal MXU pass: one matmul yields both
    #      state@w1 (cols 0:h_dim) and action@w2a (cols out_col0:out_col0+h_dim).
    bd = jnp.dot(sa, wbd_ref[...], preferred_element_type=jnp.float32)
    h = bd[:, :h_dim]                              # fc1 output, WITHOUT b1 (BN cancels it)
    act_contrib = bd[:, out_col0:out_col0 + h_dim]  # action part of fc2

    # ---- BatchNorm1d (training mode: batch mean, biased variance) ----
    # Padded batch rows of h are exactly 0 (zero inputs, no bias), so statistics
    # need only a scalar correction for the padded rows' contribution to sumsq.
    inv_n = jnp.float32(1.0 / n_valid)
    mu = jnp.sum(h, axis=0, keepdims=True) * inv_n
    d = h - mu
    ss = jnp.sum(d * d, axis=0, keepdims=True)
    if n_pad:  # static Python branch
        ss = ss - jnp.float32(n_pad) * (mu * mu)
    var = ss * inv_n
    scale = jax.lax.rsqrt(var + EPS) * bn_g        # folded BN affine: 2 full-width ops
    shift = bn_b - mu * scale
    h = h * scale + shift

    # ---- LayerNorm over the feature axis ----
    m = jnp.mean(h, axis=-1, keepdims=True)
    v = jnp.mean((h - m) ** 2, axis=-1, keepdims=True)
    h = (h - m) * jax.lax.rsqrt(v + EPS) * ln_g + ln_b

    s1 = jnp.maximum(h, 0.0).astype(jnp.bfloat16)

    # ---- fc2 on concat([s1, action]) as split matmul (action part already done) ----
    h2 = (jnp.dot(s1, w2s_ref[...], preferred_element_type=jnp.float32)
          + act_contrib + b2)
    h2 = jnp.maximum(h2, 0.0)

    # ---- fc3 (H -> 1) as VPU multiply + lane reduction (no N=1 MXU pass) ----
    out_ref[...] = jnp.sum(h2 * w3_row, axis=-1, keepdims=True) + b3


# ----------------------------------------------------------------------------
# Wrapper
# ----------------------------------------------------------------------------
def critic_forward(state, action, packed):
    B = state.shape[0]
    h_dim = packed["h_dim"]
    s_pad, a_pad = packed["s_pad"], packed["a_pad"]
    out_col0 = packed["out_col0"]
    Bp = _round_up(B, 8)
    Kc = s_pad + a_pad

    # Single bf16 activation slab: state in cols [0:state_dim], action in
    # cols [s_pad : s_pad+action_dim]; padded rows/cols are zero (inert — the
    # corresponding weight rows are zero, and BN stats correct for zero rows).
    sa = jnp.zeros((Bp, Kc), jnp.bfloat16)
    sa = sa.at[:B, :state.shape[1]].set(state.astype(jnp.bfloat16))
    sa = sa.at[:B, s_pad:s_pad + action.shape[1]].set(action.astype(jnp.bfloat16))

    kernel = functools.partial(critic_kernel, n_valid=B, n_pad=Bp - B,
                               h_dim=h_dim, out_col0=out_col0)
    vmem = pl.BlockSpec(memory_space=pltpu.MemorySpace.VMEM)
    out = pl.pallas_call(
        kernel,
        out_shape=jax.ShapeDtypeStruct((Bp, 1), jnp.float32),
        in_specs=[vmem, vmem, vmem, vmem],
        out_specs=vmem,
        compiler_params=pltpu.CompilerParams(vmem_limit_bytes=32 << 20),
    )(sa, packed["w_bd"], packed["w2s"], packed["pk"])
    return out[:B]


# ----------------------------------------------------------------------------
# Parameter initialization (mirrors the PyTorch __init__) and packing.
# ----------------------------------------------------------------------------
def xavier_uniform(key, fan_in, fan_out):
    bound = math.sqrt(6.0 / (fan_in + fan_out))
    return jax.random.uniform(key, (fan_in, fan_out), jnp.float32, -bound, bound)


def linear_bias(key, fan_in, fan_out):
    bound = 1.0 / math.sqrt(fan_in)
    return jax.random.uniform(key, (1, fan_out), jnp.float32, -bound, bound)


def init_params(key, state_size, action_size, output_size=1, h_dim=400):
    ks = jax.random.split(key, 6)
    w2_full = xavier_uniform(ks[2], h_dim + action_size, h_dim)
    return {
        "w1": xavier_uniform(ks[0], state_size, h_dim),
        "b1": linear_bias(ks[1], state_size, h_dim),   # kept for the reference / eval-mode BN
        "bn_g": jnp.ones((1, h_dim), jnp.float32),
        "bn_b": jnp.zeros((1, h_dim), jnp.float32),
        "ln_g": jnp.ones((1, h_dim), jnp.float32),
        "ln_b": jnp.zeros((1, h_dim), jnp.float32),
        "w2s": w2_full[:h_dim, :],          # fc2 weight, s1 part
        "w2a": w2_full[h_dim:, :],          # fc2 weight, action part
        "b2": linear_bias(ks[3], h_dim + action_size, h_dim),
        "w3": xavier_uniform(ks[4], h_dim, output_size),
        "b3": linear_bias(ks[5], h_dim, output_size),
    }


def pack_params(p, state_size, action_size, h_dim=400):
    """Pack parameters into three kernel inputs (done once, outside the hot path)."""
    s_pad = _round_up(state_size, 16)    # bf16 sublane packing = 16 rows
    a_pad = _round_up(action_size, 16)
    out_col0 = _round_up(h_dim, 128)     # 128-lane aligned start of the action block
    n_bd = out_col0 + _round_up(h_dim, 128)

    # Block-diagonal weight: w1 in [0:state, 0:h_dim], w2a in [s_pad:, out_col0:+h_dim].
    wbd = jnp.zeros((s_pad + a_pad, n_bd), jnp.float32)
    wbd = wbd.at[:state_size, :h_dim].set(p["w1"])
    wbd = wbd.at[s_pad:s_pad + action_size, out_col0:out_col0 + h_dim].set(p["w2a"])

    pk = jnp.zeros((8, h_dim), jnp.float32)
    pk = pk.at[0].set(p["bn_g"][0])
    pk = pk.at[1].set(p["bn_b"][0])
    pk = pk.at[2].set(p["ln_g"][0])
    pk = pk.at[3].set(p["ln_b"][0])
    pk = pk.at[4].set(p["b2"][0])
    pk = pk.at[5].set(p["w3"][:, 0])
    pk = pk.at[6, 0].set(p["b3"][0, 0])

    return {"w_bd": wbd.astype(jnp.bfloat16),
            "w2s": p["w2s"].astype(jnp.bfloat16),
            "pk": pk,
            "h_dim": h_dim, "s_pad": s_pad, "a_pad": a_pad, "out_col0": out_col0}


# ----------------------------------------------------------------------------
# Pure-JAX references (for correctness checks).
# ----------------------------------------------------------------------------
def critic_ref_f32(state, action, p):
    h = state @ p["w1"] + p["b1"]
    mu = h.mean(0, keepdims=True)
    var = ((h - mu) ** 2).mean(0, keepdims=True)
    h = (h - mu) * jax.lax.rsqrt(var + EPS) * p["bn_g"] + p["bn_b"]
    m = h.mean(-1, keepdims=True)
    v = ((h - m) ** 2).mean(-1, keepdims=True)
    h = (h - m) * jax.lax.rsqrt(v + EPS) * p["ln_g"] + p["ln_b"]
    s1 = jnp.maximum(h, 0.0)
    x = jnp.concatenate([s1, action], axis=1)
    w2 = jnp.concatenate([p["w2s"], p["w2a"]], axis=0)
    h2 = jnp.maximum(x @ w2 + p["b2"], 0.0)
    return h2 @ p["w3"] + p["b3"]


def critic_ref_bf16(state, action, p):
    # Emulates the kernel: bf16 operands, f32 accumulation, no b1 (cancelled by BN).
    def bdot(a, w):
        a16 = a.astype(jnp.bfloat16).astype(jnp.float32)
        w16 = w.astype(jnp.bfloat16).astype(jnp.float32)
        return jnp.dot(a16, w16, preferred_element_type=jnp.float32)

    h = bdot(state, p["w1"])
    mu = h.mean(0, keepdims=True)
    var = ((h - mu) ** 2).mean(0, keepdims=True)
    h = (h - mu) * jax.lax.rsqrt(var + EPS) * p["bn_g"] + p["bn_b"]
    m = h.mean(-1, keepdims=True)
    v = ((h - m) ** 2).mean(-1, keepdims=True)
    h = (h - m) * jax.lax.rsqrt(v + EPS) * p["ln_g"] + p["ln_b"]
    s1 = jnp.maximum(h, 0.0)
    h2 = jnp.maximum(bdot(s1, p["w2s"]) + bdot(action, p["w2a"]) + p["b2"], 0.0)
    return jnp.sum(h2 * p["w3"][:, 0][None, :], axis=-1, keepdims=True) + p["b3"]


# ----------------------------------------------------------------------------
if __name__ == "__main__":
    state_size = 16
    action_size = 8

    key = jax.random.PRNGKey(0)
    params = init_params(jax.random.fold_in(key, 1), state_size, action_size)
    packed = pack_params(params, state_size, action_size)

    def check(batch):
        ks, ka = jax.random.split(jax.random.fold_in(key, 1000 + batch))
        state = jax.random.normal(ks, (batch, state_size), jnp.float32)
        action = jax.random.normal(ka, (batch, action_size), jnp.float32)

        out = jax.block_until_ready(critic_forward(state, action, packed))
        assert out.shape == (batch, 1), out.shape
        assert bool(jnp.all(jnp.isfinite(out)))

        ref32 = critic_ref_f32(state, action, params)
        refbf = critic_ref_bf16(state, action, params)
        scale = float(jnp.max(jnp.abs(ref32))) + 1.0
        err_bf = float(jnp.max(jnp.abs(out - refbf)))
        err_32 = float(jnp.max(jnp.abs(out - ref32)))
        assert err_bf < 1e-2 * scale, f"B={batch}: bf16-emulated mismatch {err_bf}"
        assert err_32 < 5e-2 * scale, f"B={batch}: f32-reference mismatch {err_32}"

    check(8)   # sublane-full batch (no padded rows)
    check(5)   # non-multiple-of-8 batch (padded rows, corrected BN statistics)

    print("KERNEL_OK")
</pallas_src>

<mosaic_0001>
module attributes {stable_mosaic.version = 11 : i64} {
  func.func @critic_kernel(%arg0: memref<8x32xbf16, #tpu.memory_space<vmem>>, %arg1: memref<32x1024xbf16, #tpu.memory_space<vmem>>, %arg2: memref<400x400xbf16, #tpu.memory_space<vmem>>, %arg3: memref<8x400xf32, #tpu.memory_space<vmem>>, %arg4: memref<8x1xf32, #tpu.memory_space<vmem>>) attributes {dimension_semantics = [], scalar_prefetch = 0 : i64, scratch_operands = 0 : i64, tpu.core_type = #tpu.core_type<tc>} {
    %c0 = arith.constant 0 : index
    %c0_0 = arith.constant 0 : index
    %0 = vector.load %arg3[%c0, %c0_0] : memref<8x400xf32, #tpu.memory_space<vmem>>, vector<8x400xf32>
    %1 = vector.extract_strided_slice %0 {offsets = [0, 0], sizes = [1, 400], strides = [1, 1]} : vector<8x400xf32> to vector<1x400xf32>
    %2 = vector.extract_strided_slice %0 {offsets = [1, 0], sizes = [1, 400], strides = [1, 1]} : vector<8x400xf32> to vector<1x400xf32>
    %3 = vector.extract_strided_slice %0 {offsets = [2, 0], sizes = [1, 400], strides = [1, 1]} : vector<8x400xf32> to vector<1x400xf32>
    %4 = vector.extract_strided_slice %0 {offsets = [3, 0], sizes = [1, 400], strides = [1, 1]} : vector<8x400xf32> to vector<1x400xf32>
    %5 = vector.extract_strided_slice %0 {offsets = [4, 0], sizes = [1, 400], strides = [1, 1]} : vector<8x400xf32> to vector<1x400xf32>
    %6 = vector.extract_strided_slice %0 {offsets = [5, 0], sizes = [1, 400], strides = [1, 1]} : vector<8x400xf32> to vector<1x400xf32>
    %7 = vector.extract_strided_slice %0 {offsets = [6, 0], sizes = [1, 1], strides = [1, 1]} : vector<8x400xf32> to vector<1x1xf32>
    %c0_1 = arith.constant 0 : index
    %c0_2 = arith.constant 0 : index
    %8 = vector.load %arg0[%c0_1, %c0_2] : memref<8x32xbf16, #tpu.memory_space<vmem>>, vector<8x32xbf16>
    %c0_3 = arith.constant 0 : index
    %c0_4 = arith.constant 0 : index
    %9 = vector.load %arg1[%c0_3, %c0_4] : memref<32x1024xbf16, #tpu.memory_space<vmem>>, vector<32x1024xbf16>
    %cst = arith.constant dense<0.000000e+00> : vector<8x1024xf32>
    %10 = tpu.matmul %8, %9, %cst {dimension_numbers = #tpu.dot_dimension_numbers<[1], [0], [0], [1], [0, 0, 1, 1], [], []>} : vector<8x32xbf16>, vector<32x1024xbf16>, vector<8x1024xf32> -> vector<8x1024xf32>
    %11 = vector.extract_strided_slice %10 {offsets = [0, 0], sizes = [8, 400], strides = [1, 1]} : vector<8x1024xf32> to vector<8x400xf32>
    %12 = vector.extract_strided_slice %10 {offsets = [0, 512], sizes = [8, 400], strides = [1, 1]} : vector<8x1024xf32> to vector<8x400xf32>
    %cst_5 = arith.constant dense<0.000000e+00> : vector<400xf32>
    %13 = vector.multi_reduction <add>, %11, %cst_5 [0] : vector<8x400xf32> to vector<400xf32>
    %14 = vector.shape_cast %13 : vector<400xf32> to vector<1x400xf32>
    %cst_6 = arith.constant 1.250000e-01 : f32
    %15 = vector.broadcast %cst_6 : f32 to vector<1x400xf32>
    %16 = arith.mulf %14, %15 : vector<1x400xf32>
    %17 = vector.broadcast %16 : vector<1x400xf32> to vector<8x400xf32>
    %18 = arith.subf %11, %17 : vector<8x400xf32>
    %19 = arith.mulf %18, %18 : vector<8x400xf32>
    %cst_7 = arith.constant dense<0.000000e+00> : vector<400xf32>
    %20 = vector.multi_reduction <add>, %19, %cst_7 [0] : vector<8x400xf32> to vector<400xf32>
    %21 = vector.shape_cast %20 : vector<400xf32> to vector<1x400xf32>
    %cst_8 = arith.constant 1.250000e-01 : f32
    %22 = vector.broadcast %cst_8 : f32 to vector<1x400xf32>
    %23 = arith.mulf %21, %22 : vector<1x400xf32>
    %cst_9 = arith.constant 9.99999974E-6 : f32
    %24 = vector.broadcast %cst_9 : f32 to vector<1x400xf32>
    %25 = arith.addf %23, %24 : vector<1x400xf32>
    %26 = math.rsqrt %25 : vector<1x400xf32>
    %27 = arith.mulf %26, %1 : vector<1x400xf32>
    %28 = arith.mulf %16, %27 : vector<1x400xf32>
    %29 = arith.subf %2, %28 : vector<1x400xf32>
    %30 = vector.broadcast %27 : vector<1x400xf32> to vector<8x400xf32>
    %31 = arith.mulf %11, %30 : vector<8x400xf32>
    %32 = vector.broadcast %29 : vector<1x400xf32> to vector<8x400xf32>
    %33 = arith.addf %31, %32 : vector<8x400xf32>
    %cst_10 = arith.constant dense<0.000000e+00> : vector<8xf32>
    %34 = vector.multi_reduction <add>, %33, %cst_10 [1] : vector<8x400xf32> to vector<8xf32>
    %35 = vector.shape_cast %34 : vector<8xf32> to vector<8x1xf32>
    %cst_11 = arith.constant 4.000000e+02 : f32
    %36 = vector.broadcast %cst_11 : f32 to vector<8x1xf32>
    %37 = arith.divf %35, %36 : vector<8x1xf32>
    %38 = vector.broadcast %37 : vector<8x1xf32> to vector<8x400xf32>
    %39 = arith.subf %33, %38 : vector<8x400xf32>
    %40 = arith.mulf %39, %39 : vector<8x400xf32>
    %cst_12 = arith.constant dense<0.000000e+00> : vector<8xf32>
    %41 = vector.multi_reduction <add>, %40, %cst_12 [1] : vector<8x400xf32> to vector<8xf32>
    %42 = vector.shape_cast %41 : vector<8xf32> to vector<8x1xf32>
    %cst_13 = arith.constant 4.000000e+02 : f32
    %43 = vector.broadcast %cst_13 : f32 to vector<8x1xf32>
    %44 = arith.divf %42, %43 : vector<8x1xf32>
    %45 = vector.broadcast %37 : vector<8x1xf32> to vector<8x400xf32>
    %46 = arith.subf %33, %45 : vector<8x400xf32>
    %cst_14 = arith.constant 9.99999974E-6 : f32
    %47 = vector.broadcast %cst_14 : f32 to vector<8x1xf32>
    %48 = arith.addf %44, %47 : vector<8x1xf32>
    %49 = math.rsqrt %48 : vector<8x1xf32>
    %50 = vector.broadcast %49 : vector<8x1xf32> to vector<8x400xf32>
    %51 = arith.mulf %46, %50 : vector<8x400xf32>
    %52 = vector.broadcast %3 : vector<1x400xf32> to vector<8x400xf32>
    %53 = arith.mulf %51, %52 : vector<8x400xf32>
    %54 = vector.broadcast %4 : vector<1x400xf32> to vector<8x400xf32>
    %55 = arith.addf %53, %54 : vector<8x400xf32>
    %cst_15 = arith.constant 0.000000e+00 : f32
    %56 = vector.broadcast %cst_15 : f32 to vector<8x400xf32>
    %57 = arith.maximumf %55, %56 : vector<8x400xf32>
    %58 = arith.truncf %57 : vector<8x400xf32> to vector<8x400xbf16>
    %c0_16 = arith.constant 0 : index
    %c0_17 = arith.constant 0 : index
    %59 = vector.load %arg2[%c0_16, %c0_17] : memref<400x400xbf16, #tpu.memory_space<vmem>>, vector<400x400xbf16>
    %cst_18 = arith.constant dense<0.000000e+00> : vector<8x400xf32>
    %60 = tpu.matmul %58, %59, %cst_18 {dimension_numbers = #tpu.dot_dimension_numbers<[1], [0], [0], [1], [0, 0, 1, 1], [], []>} : vector<8x400xbf16>, vector<400x400xbf16>, vector<8x400xf32> -> vector<8x400xf32>
    %61 = arith.addf %60, %12 : vector<8x400xf32>
    %62 = vector.broadcast %5 : vector<1x400xf32> to vector<8x400xf32>
    %63 = arith.addf %61, %62 : vector<8x400xf32>
    %cst_19 = arith.constant 0.000000e+00 : f32
    %64 = vector.broadcast %cst_19 : f32 to vector<8x400xf32>
    %65 = arith.maximumf %63, %64 : vector<8x400xf32>
    %66 = vector.broadcast %6 : vector<1x400xf32> to vector<8x400xf32>
    %67 = arith.mulf %65, %66 : vector<8x400xf32>
    %cst_20 = arith.constant dense<0.000000e+00> : vector<8xf32>
    %68 = vector.multi_reduction <add>, %67, %cst_20 [1] : vector<8x400xf32> to vector<8xf32>
    %69 = vector.shape_cast %68 : vector<8xf32> to vector<8x1xf32>
    %70 = vector.broadcast %7 : vector<1x1xf32> to vector<8x1xf32>
    %71 = arith.addf %69, %70 : vector<8x1xf32>
    %c0_21 = arith.constant 0 : index
    %c0_22 = arith.constant 0 : index
    %72 = vector.load %arg4[%c0_21, %c0_22] : memref<8x1xf32, #tpu.memory_space<vmem>>, vector<8x1xf32>
    tpu.vector_store %arg4[%c0_21, %c0_22], %71 {strides = array<i32>} : memref<8x1xf32, #tpu.memory_space<vmem>>, vector<8x1xf32>,
    return
  }
}

</mosaic_0001>

<bundles_post_ra>
// kernel: tpu_custom_call.1
= control target key start
LH: loop header
LB: loop body
LE: loop exit
PB: predicated region body
PF: predicated region fallthrough
CT: control target
= control target key end

     0   :  { %9 = vsyncpa [#allocation3], 0  ;;  %s1961_s0 = inlined_call_operand.hbm [shape: bf16[8,32], index: 0, kind: input, shape index: {}]   ;;  %s1962_s1 = inlined_call_operand.hbm [shape: bf16[32,1024], index: 1, kind: input, shape index: {}]   ;;  %s1963_s2 = inlined_call_operand.hbm [shape: bf16[400,400], index: 2, kind: input, shape index: {}]   ;;  %s1964_s3 = inlined_call_operand.hbm [shape: f32[8,400], index: 3, kind: input, shape index: {}]   ;;  %s1965_s4 = inlined_call_operand.vmem [shape: f32[8,1], index: 4, kind: output, shape index: {}]  }
   0x1   :  { %10 = vsyncpa [#allocation5], 0 }
   0x2   :  { %11 = vsyncpa [#allocation8], 0  ;;  %s1762_s15 = smov [#allocation4]  }
   0x3   :  { %s27_s16 = sshll.u32 %s1762_s15, 4  ;;  %s28_s16 = int_to_ptr.vmem [resolvable:$true] %s27_s16 }
   0x4   :  { %s1684_s17 = scalar_lea.vmem %s28_s16, 2048  ;;  %p1689_p1 = scmp.lt.s32.totalorder %s28_s16, %s28_s16 }
   0x5   :  { %p1685_p0 = scmp.ne.s32.totalorder %s28_s16, %s1684_s17  ;;  %p1690_p2 = scmp.lt.s32.totalorder %s1684_s17, %s1684_s17 }
   0x7   :  { %p1691_p3 = por %p1690_p2, %p1689_p1 }
   0x9   :  { %p1692_p4 = pnand %p1691_p3, %p1685_p0 }
   0xb   :  { %1695 = shalt.err (!%p1692_p4)
}
   0xc   :  { %s1763_s18 = smov 512   ;;  %s1764_s19 = smov 32  }
   0xd   :  { %33 = dma.hbm_to_vmem [thread:$0]  %s1962_s1, 2048, %s28_s16, [#allocation5], %s1763_s18, %s1763_s18, %s1764_s19  }
   0xe   :  { %s1765_s22 = smov [#allocation2]   ;;  %s1766_s24 = smov [#allocation6]  }
   0xf   :  { %s18_s23 = sshll.u32 %s1765_s22, 4  ;;  %s39_s25 = sshll.u32 %s1766_s24, 4  ;;  %s19_s23 = int_to_ptr.vmem [resolvable:$true] %s18_s23  ;;  %s40_s25 = int_to_ptr.vmem [resolvable:$true] %s39_s25 }
  0x10   :  { %s1704_s26 = scalar_lea.vmem %s19_s23, 64  ;;  %p1709_p6 = scmp.lt.s32.totalorder %s19_s23, %s19_s23 }
  0x11   :  { %p1705_p5 = scmp.ne.s32.totalorder %s19_s23, %s1704_s26  ;;  %p1710_p7 = scmp.lt.s32.totalorder %s1704_s26, %s1704_s26 }
  0x13   :  { %p1711_p8 = por %p1710_p7, %p1709_p6 }
  0x15   :  { %p1712_p9 = pnand %p1711_p8, %p1705_p5 }
  0x17   :  { %1715 = shalt.err (!%p1712_p9)
}
  0x18   :  { %21 = dma.hbm_to_vmem [thread:$0]  %s1961_s0, 64, %s19_s23, [#allocation3]  }
  0x19   :  { %s1724_s29 = scalar_lea.vmem %s40_s25, 12800  ;;  %p1729_p11 = scmp.lt.s32.totalorder %s40_s25, %s40_s25 }
  0x1a   :  { %p1725_p10 = scmp.ne.s32.totalorder %s40_s25, %s1724_s29  ;;  %p1730_p12 = scmp.lt.s32.totalorder %s1724_s29, %s1724_s29 }
  0x1c   :  { %p1731_p13 = por %p1730_p12, %p1729_p11 }
  0x1e   :  { %p1732_p0 = pnand %p1731_p13, %p1725_p10 }
  0x20   :  { %1735 = shalt.err (!%p1732_p0)
}
  0x21   :  { %s1767_s1 = smov 256   ;;  %s1768_s30 = smov 16  }
  0x22   :  { %45 = dma.hbm_to_vmem [thread:$0]  %s1963_s2, 12800, %s40_s25, [#allocation5], %s1767_s1, %s1767_s1, %s1768_s30  }
  0x23   :  { %s1769_s7 = smov [#allocation7]  }
  0x24   :  { %s52_s8 = sshll.u32 %s1769_s7, 4  ;;  %s53_s8 = int_to_ptr.vmem [resolvable:$true] %s52_s8 }
  0x25   :  { %s1744_s9 = scalar_lea.vmem %s53_s8, 512  ;;  %p1749_p2 = scmp.lt.s32.totalorder %s53_s8, %s53_s8 }
  0x26   :  { %p1745_p1 = scmp.ne.s32.totalorder %s53_s8, %s1744_s9  ;;  %p1750_p3 = scmp.lt.s32.totalorder %s1744_s9, %s1744_s9 }
  0x28   :  { %p1751_p4 = por %p1750_p3, %p1749_p2 }
  0x2a   :  { %p1752_p5 = pnand %p1751_p4, %p1745_p1 }
  0x2c   :  { %1755 = shalt.err (!%p1752_p5)
}
  0x2d   :  { %55 = dma.hbm_to_vmem [thread:$0]  %s1964_s3, 512, %s53_s8, [#allocation8]  }
  0x2e   :  { %1756 = dma.done.wait [#allocation3], 64  }
  0x2f   :  { %1757 = vsyncadd [#allocation3], 4294967232 }
  0x30   :  { %1758 = dma.done.wait [#allocation5], 14848  }
  0x31   :  { %1759 = vsyncadd [#allocation5], 4294952448 }
  0x32   :  { %1760 = dma.done.wait [#allocation8], 512  }
  0x33   :  { %1761 = vsyncadd [#allocation8], 4294966784  ;;  %v1770_v0 = vmov 0   ;;  %v82_v1 = vld [vmem:[#allocation4 + $0x40] sm:$0xff]  ;;  %v83_v3 = vld [vmem:[#allocation4 + $0x48] sm:$0xff]  ;;  %vm170_vm0 = vcmask 261120  }
  0x34   :  { %206 = vmatprep.mubr.bf16.mxu0 %v1770_v0  ;;  %247 = vmatprep.mubr.bf16.mxu1 %v1770_v0  ;;  %v86_v2 = vld [vmem:[#allocation4 + $0x60] sm:$0xff]  ;;  %v87_v5 = vld [vmem:[#allocation4 + $0x68] sm:$0xff]  ;;  %v1808_v17 = vld [vmem:[#allocation2] sm:$0xf]  ;;  %vm356_vm1 = vcmask 130048   ;;  %vm1376_vm2 = vcmask 7168  }
  0x35   :  { %v1394_v4 = vcombine.high %v82_v1, %v86_v2  ;;  %v1393_v6 = vcombine.low %v82_v1, %v86_v2  ;;  %v74_v7 = vld [vmem:[#allocation4] sm:$0xff]  ;;  %v1396_v9 = vcombine.high %v83_v3, %v87_v5  ;;  %v1395_v10 = vcombine.low %v83_v3, %v87_v5  ;;  %v75_v12 = vld [vmem:[#allocation4 + $0x8] sm:$0xff] }
  0x36   :  { %v78_v8 = vld [vmem:[#allocation4 + $0x20] sm:$0xff]  ;;  %v79_v13 = vld [vmem:[#allocation4 + $0x28] sm:$0xff] }
  0x37   :  { %v1386_v11 = vcombine.high %v74_v7, %v78_v8  ;;  %186 = vmatprep.subr.bf16.mxu0 %v1394_v4  ;;  %v1388_v14 = vcombine.high %v75_v12, %v79_v13  ;;  %227 = vmatprep.subr.bf16.mxu1 %v1396_v9  ;;  %v1385_v15 = vcombine.low %v74_v7, %v78_v8 }
  0x38   :  { %187 = vmatpush1.bf16.msra.mxu0 %v1393_v6  ;;  %228 = vmatpush1.bf16.msra.mxu1 %v1395_v10  ;;  %v1387_v16 = vcombine.low %v75_v12, %v79_v13 }
  0x39   :  { %188 = vmatprep.subr.bf16.mxu0 %v1386_v11  ;;  %229 = vmatprep.subr.bf16.mxu1 %v1388_v14 }
  0x3c   :  { %189 = vmatpush1.bf16.msra.mxu0 %v1385_v15  ;;  %230 = vmatpush1.bf16.msra.mxu1 %v1387_v16 }
  0x3f   :  { %1401 = vmatmul.mubr.msk.bf16.vlgmr.msra.gmra.mxu0 %vm170_vm0, %v1808_v17  ;;  %1402 = vmatmul.mubr.msk.bf16.vlgmr.msra.gmra.mxu1 %vm170_vm0, %v1808_v17 }
  0x40   :  { %288 = vmatprep.mubr.bf16.mxu0 %v1770_v0  ;;  %329 = vmatprep.mubr.bf16.mxu1 %v1770_v0 }
  0xff   :  { %v1814_v18 = vpop.f32.mrf.mxu0  ;;  %v1817_v20 = vpop.f32.mrf.mxu1 }
 0x100   :  { %v338_v19 = vrot.slane %v1814_v18, 4  ;;  %v350_v21 = vrot.slane %v1817_v20, 4 }
 0x101   :  { %v1820_v22 = vpop.f32.mrf.mxu0  ;;  %v1824_v25 = vpop.f32.mrf.mxu1 }
 0x102   :  { %v339_v23 = vadd.f32 %v338_v19, %v1814_v18  ;;  %v344_v24 = vrot.slane %v1820_v22, 4  ;;  %v351_v26 = vadd.f32 %v350_v21, %v1817_v20  ;;  %v357_v27 = vsel %vm356_vm1, %v1824_v25, 0.0 }
 0x103   :  { %v212_v28 = vpop.f32.mrf.mxu0  ;;  %v358_v31 = vrot.slane %v357_v27, 4  ;;  %v253_v32 = vpop.f32.mrf.mxu1 }
 0x104   :  { %v340_v29 = vrot.slane %v339_v23, 2  ;;  %v345_v30 = vadd.f32 %v344_v24, %v1820_v22  ;;  %v352_v33 = vrot.slane %v351_v26, 2 }
 0x105   :  { %v213_v34 = vpop.f32.mrf.mxu0  ;;  %v359_v37 = vadd.f32 %v358_v31, %v357_v27  ;;  %v254_v38 = vpop.f32.mrf.mxu1 }
 0x106   :  { %v341_v35 = vadd.f32 %v340_v29, %v339_v23  ;;  %v346_v36 = vrot.slane %v345_v30, 2  ;;  %v353_v39 = vadd.f32 %v352_v33, %v351_v26  ;;  %v1844_v38 = vld [vmem:[#allocation7] sm:$0xff] }
 0x107   :  { %v360_v42 = vrot.slane %v359_v37, 2 }
 0x108   :  { %v342_v40 = vrot.slane %v341_v35, 1  ;;  %v347_v41 = vadd.f32 %v346_v36, %v345_v30  ;;  %v354_v43 = vrot.slane %v353_v39, 1 }
 0x109   :  { %v361_v46 = vadd.f32 %v360_v42, %v359_v37  ;;  %v437_v37 = vlaneseq  ;;  %v1850_v42 = vld [vmem:[#allocation7 + $0x8] sm:$0xff] }
 0x10a   :  { %v343_v44 = vadd.f32 %v342_v40, %v341_v35  ;;  %v348_v45 = vrot.slane %v347_v41, 1  ;;  %v355_v47 = vadd.f32 %v354_v43, %v353_v39  ;;  %v1848_v40 = vld [vmem:[#allocation7 + $0x10] sm:$0xff] }
 0x10b   :  { %v362_v50 = vrot.slane %v361_v46, 1  ;;  %v1846_v39 = vshrl.u32 %v437_v37, 7 }
 0x10c   :  { %v364_v48 = vmul.f32 0.125, %v343_v44  ;;  %v349_v49 = vadd.f32 %v348_v45, %v347_v41  ;;  %v1830_v51 = vmul.f32 0.125, %v355_v47 }
 0x10d   :  { %v363_v54 = vadd.f32 %v362_v50, %v361_v46 }
 0x10e   :  { %v368_v52 = vsub.f32 %v1814_v18, %v364_v48  ;;  %v1833_v53 = vmul.f32 0.125, %v349_v49  ;;  %v370_v55 = vsub.f32 %v1817_v20, %v1830_v51  ;;  %v439_v49 = vsub.s32 0, %v1846_v39 }
 0x10f   :  { %v1839_v58 = vmul.f32 0.125, %v363_v54 }
 0x110   :  { %v372_v56 = vmul.f32 %v368_v52, %v368_v52  ;;  %v369_v57 = vsub.f32 %v1820_v22, %v1833_v53  ;;  %v374_v59 = vmul.f32 %v370_v55, %v370_v55  ;;  %v1856_v52 = vld [vmem:[#allocation7 + $0x18] sm:$0xff] }
 0x111   :  { %v371_v62 = vsub.f32 %v1824_v25, %v1839_v58 }
 0x112   :  { %v376_v60 = vrot.slane %v372_v56, 4  ;;  %v373_v61 = vmul.f32 %v369_v57, %v369_v57  ;;  %v388_v63 = vrot.slane %v374_v59, 4 }
 0x113   :  { %v375_v2 = vmul.f32 %v371_v62, %v371_v62 }
 0x114   :  { %v377_v0 = vadd.f32 %v376_v60, %v372_v56  ;;  %v382_v1 = vrot.slane %v373_v61, 4  ;;  %v389_v3 = vadd.f32 %v388_v63, %v374_v59  ;;  %v459_v59 = vsub.s32 1, %v1846_v39 }
 0x115   :  { %v394_v6 = vsel %vm356_vm1, %v375_v2, 0.0 }
 0x116   :  { %v378_v4 = vrot.slane %v377_v0, 2  ;;  %v383_v5 = vadd.f32 %v382_v1, %v373_v61  ;;  %v390_v7 = vrot.slane %v389_v3, 2  ;;  %v395_v8 = vrot.slane %v394_v6, 4 }
 0x118   :  { %v379_v9 = vadd.f32 %v378_v4, %v377_v0  ;;  %v384_v10 = vrot.slane %v383_v5, 2  ;;  %v391_v11 = vadd.f32 %v390_v7, %v389_v3  ;;  %v396_v12 = vadd.f32 %v395_v8, %v394_v6 }
 0x11a   :  { %v380_v13 = vrot.slane %v379_v9, 1  ;;  %v385_v14 = vadd.f32 %v384_v10, %v383_v5  ;;  %v392_v15 = vrot.slane %v391_v11, 1  ;;  %v397_v16 = vrot.slane %v396_v12, 2 }
 0x11c   :  { %v381_v19 = vadd.f32 %v380_v13, %v379_v9  ;;  %v386_v21 = vrot.slane %v385_v14, 1  ;;  %v393_v23 = vadd.f32 %v392_v15, %v391_v11  ;;  %v398_v24 = vadd.f32 %v397_v16, %v396_v12 }
 0x11e   :  { %v401_v26 = vmul.f32 0.125, %v381_v19  ;;  %v387_v27 = vadd.f32 %v386_v21, %v385_v14  ;;  %v403_v28 = vmul.f32 0.125, %v393_v23  ;;  %v399_v29 = vrot.slane %v398_v24, 1  ;;  %v84_v21 = vld [vmem:[#allocation4 + $0x50] sm:$0xff] }
 0x11f   :  { %v88_v23 = vld [vmem:[#allocation4 + $0x70] sm:$0xff] }
 0x120   :  { %v405_v30 = vadd.f32 1e-05, %v401_v26  ;;  %v402_v31 = vmul.f32 0.125, %v387_v27  ;;  %v407_v32 = vadd.f32 1e-05, %v403_v28  ;;  %v400_v33 = vadd.f32 %v399_v29, %v398_v24  ;;  %v76_v24 = vld [vmem:[#allocation4 + $0x10] sm:$0xff] }
 0x121   :  { %v1397_v26 = vcombine.low %v84_v21, %v88_v23  ;;  %v80_v27 = vld [vmem:[#allocation4 + $0x30] sm:$0xff] }
 0x122   :  { %1666 = vrsqrt.f32 %v405_v30  ;;  %v406_v34 = vadd.f32 1e-05, %v402_v31  ;;  %v404_v35 = vmul.f32 0.125, %v400_v33  ;;  %v1390_v28 = vcombine.high %v76_v24, %v80_v27  ;;  %v85_v30 = vld [vmem:[#allocation4 + $0x58] sm:$0xff] }
 0x123   :  { %1668 = vrsqrt.f32 %v407_v32  ;;  %v1389_v29 = vcombine.low %v76_v24, %v80_v27  ;;  %v89_v31 = vld [vmem:[#allocation4 + $0x78] sm:$0xff]  ;;  %v1518_v32 = vld [vmem:[#allocation6 + $0xe4] ss:$16 sps:$4 sm:$0xff]  }
 0x124   :  { %1670 = vrsqrt.f32 %v406_v34  ;;  %v408_v36 = vadd.f32 1e-05, %v404_v35  ;;  %v1399_v33 = vcombine.low %v85_v30, %v89_v31  ;;  %v1400_v34 = vcombine.high %v85_v30, %v89_v31  ;;  %v77_v35 = vld [vmem:[#allocation4 + $0x18] sm:$0xff]  ;;  %v1566_v24 = vld [vmem:[#allocation6 + $0x264] ss:$16 sps:$4 sm:$0xff]  }
 0x125   :  { %v1569_v27 = vld [vmem:[#allocation6 + $0x164] ss:$16 sps:$4 sm:$0xff]   ;;  %v1570_v30 = vld [vmem:[#allocation6 + $0x240] ss:$16 sps:$4 sm:$0xff]  }
 0x126   :  { %1672 = vrsqrt.f32 %v408_v36  ;;  %v81_v36 = vld [vmem:[#allocation4 + $0x38] sm:$0xff]  ;;  %309 = vmatprep.subr.bf16.mxu1 %v1400_v34  ;;  %v1575_v31 = vld [vmem:[#allocation6 + $0x144] ss:$16 sps:$4 sm:$0xff]   ;;  %v1576_v34 = vld [vmem:[#allocation6 + $0x220] ss:$16 sps:$4 sm:$0xff]  }
 0x127   :  { %v1392_v37 = vcombine.high %v77_v35, %v81_v36  ;;  %310 = vmatpush1.bf16.msra.mxu1 %v1399_v33  ;;  %v1573_v33 = vld [vmem:[#allocation6 + $0x140] ss:$16 sps:$4 sm:$0xff]  }
 0x129   :  { %311 = vmatprep.subr.bf16.mxu1 %v1392_v37  ;;  %v1579_v37 = vld [vmem:[#allocation6 + $0x120] ss:$16 sps:$4 sm:$0xff]  }
 0x12f   :  { %v1667_v41 = vpop.eup %1666 }
 0x130   :  { %v1669_v43 = vpop.eup %1668  ;;  %v413_v44 = vmul.f32 %v1667_v41, %v1844_v38  ;;  %v1516_v41 = vld [vmem:[#allocation6 + $0xe0] ss:$16 sps:$4 sm:$0xff]  }
 0x131   :  { %v1671_v45 = vpop.eup %1670  ;;  %v415_v46 = vmul.f32 %v1669_v43, %v1848_v40  ;;  %v1391_v43 = vcombine.low %v77_v35, %v81_v36  ;;  %v1581_v35 = vld [vmem:[#allocation6 + $0x124] ss:$16 sps:$4 sm:$0xff]  }
 0x132   :  { %v417_v47 = vmul.f32 %v413_v44, %v364_v48  ;;  %v414_v50 = vmul.f32 %v1671_v45, %v1850_v42  ;;  %v440_v62 = vrot.slane %v413_v44, %v439_v49  ;;  %v1521_v44 = vld [vmem:[#allocation6 + $0xc4] ss:$16 sps:$4 sm:$0xff]  }
 0x133   :  { %v419_v54 = vmul.f32 %v415_v46, %v1830_v51  ;;  %v1673_v55 = vpop.eup %1672  ;;  %v448_v3 = vrot.slane %v415_v46, %v439_v49  ;;  %v1542_v45 = vld [vmem:[#allocation6 + $0x2e4] ss:$16 sps:$4 sm:$0xff]   ;;  %v1519_v46 = vld [vmem:[#allocation6 + $0xc0] ss:$16 sps:$4 sm:$0xff]   ;;  %312 = vmatpush1.bf16.msra.mxu1 %v1391_v43 }
 0x134   :  { %v425_v56 = vrot.slane %v417_v47, 7  ;;  %v418_v57 = vmul.f32 %v414_v50, %v1833_v53  ;;  %v416_v60 = vmul.f32 %v1673_v55, %v1856_v52  ;;  %v444_v48 = vrot.slane %v414_v50, %v439_v49  ;;  %v1540_v47 = vld [vmem:[#allocation6 + $0x2e0] ss:$16 sps:$4 sm:$0xff]   ;;  %1198 = vmatprep.subr.bf16.mxu1 %v1542_v45  ;;  %v1548_v50 = vld [vmem:[#allocation6 + $0x2c4] ss:$16 sps:$4 sm:$0xff]  }
 0x135   :  { %v427_v61 = vrot.slane %v419_v54, 7  ;;  %v453_v6 = vmul.f32 %v440_v62, %v1814_v18  ;;  %v455_v11 = vmul.f32 %v448_v3, %v1817_v20  ;;  %v1522_v54 = vld [vmem:[#allocation6 + $0xa0] ss:$16 sps:$4 sm:$0xff]   ;;  %v1584_v36 = vld [vmem:[#allocation6 + $0x204] ss:$16 sps:$4 sm:$0xff]  }
 0x136   :  { %v426_v63 = vrot.slane %v418_v57, 7  ;;  %v433_v0 = vsub.f32 %v1844_v38, %v425_v56  ;;  %v420_v1 = vmul.f32 %v416_v60, %v1839_v58  ;;  %v452_v53 = vrot.slane %v416_v60, %v439_v49  ;;  %v1524_v49 = vld [vmem:[#allocation6 + $0xa4] ss:$16 sps:$4 sm:$0xff]   ;;  %1404 = vmatmul.mubr.msk.bf16.vlgmr.msra.gmra.mxu1 %vm170_vm0, %v1808_v17  ;;  %v1546_v55 = vld [vmem:[#allocation6 + $0x2c0] ss:$16 sps:$4 sm:$0xff]  }
 0x137   :  { %v435_v2 = vsub.f32 %v1848_v40, %v427_v61  ;;  %v454_v7 = vmul.f32 %v444_v48, %v1820_v22  ;;  %1199 = vmatpush1.bf16.msra.mxu1 %v1540_v47  ;;  %v1527_v56 = vld [vmem:[#allocation6 + $0x84] ss:$16 sps:$4 sm:$0xff]   ;;  %v1525_v57 = vld [vmem:[#allocation6 + $0x80] ss:$16 sps:$4 sm:$0xff]   ;;  %v1593_v47 = vld [vmem:[#allocation6 + $0xec] ss:$16 sps:$4 sm:$0xff]  }
 0x138   :  { %v434_v51 = vsub.f32 %v1850_v42, %v426_v63  ;;  %v460_v4 = vrot.slane %v433_v0, %v459_v59  ;;  %v428_v5 = vrot.slane %v420_v1, 7  ;;  %v456_v13 = vmul.f32 %v452_v53, %v1824_v25  ;;  %1200 = vmatprep.subr.bf16.mxu1 %v1548_v50  ;;  %v1528_v60 = vld [vmem:[#allocation6 + $0x60] ss:$16 sps:$4 sm:$0xff]   ;;  %v1533_v61 = vld [vmem:[#allocation6 + $0x44] ss:$16 sps:$4 sm:$0xff]  }
 0x139   :  { %v468_v9 = vrot.slane %v435_v2, %v459_v59  ;;  %v1398_v25 = vcombine.high %v84_v21, %v88_v23  ;;  %v1531_v62 = vld [vmem:[#allocation6 + $0x40] ss:$16 sps:$4 sm:$0xff]   ;;  %v1539_v48 = vld [vmem:[#allocation6 + $0x4] ss:$16 sps:$4 sm:$0xff]  }
 0x13a   :  { %v464_v8 = vrot.slane %v434_v51, %v459_v59  ;;  %v436_v10 = vsub.f32 %v1856_v52, %v428_v5  ;;  %v1870_v12 = vadd.f32 %v460_v4, %v453_v6  ;;  %v1534_v63 = vld [vmem:[#allocation6 + $0x20] ss:$16 sps:$4 sm:$0xff]   ;;  %v1545_v1 = vld [vmem:[#allocation6 + $0x1e4] ss:$16 sps:$4 sm:$0xff]  }
 0x13b   :  { %v1875_v15 = vadd.f32 %v468_v9, %v455_v11  ;;  %268 = vmatprep.subr.bf16.mxu0 %v1398_v25  ;;  %1201 = vmatpush1.bf16.msra.mxu1 %v1546_v55  ;;  %v1537_v0 = vld [vmem:[#allocation6] ss:$16 sps:$4 sm:$0xff]   ;;  %v1563_v23 = vld [vmem:[#allocation6 + $0x184] ss:$16 sps:$4 sm:$0xff]  }
 0x13c   :  { %v1872_v58 = vadd.f32 %v464_v8, %v454_v7  ;;  %v472_v14 = vrot.slane %v436_v10, %v459_v59  ;;  %269 = vmatpush1.bf16.msra.mxu0 %v1397_v26  ;;  %v1530_v59 = vld [vmem:[#allocation6 + $0x64] ss:$16 sps:$4 sm:$0xff]   ;;  %v1543_v2 = vld [vmem:[#allocation6 + $0x1e0] ss:$16 sps:$4 sm:$0xff]  }
 0x13d   :  { %270 = vmatprep.subr.bf16.mxu0 %v1390_v28  ;;  %v1558_v21 = vld [vmem:[#allocation6 + $0x280] ss:$16 sps:$4 sm:$0xff]   ;;  %v1572_v28 = vld [vmem:[#allocation6 + $0x244] ss:$16 sps:$4 sm:$0xff]  }
 0x13e   :  { %v477_v18 = vadd.f32 %v1872_v58, %v1870_v12  ;;  %v1879_v16 = vadd.f32 %v472_v14, %v456_v13  ;;  %v1551_v14 = vld [vmem:[#allocation6 + $0x1c4] ss:$16 sps:$4 sm:$0xff]   ;;  %v1561_v26 = vld [vmem:[#allocation6 + $0x180] ss:$16 sps:$4 sm:$0xff]  }
 0x13f   :  { %v1564_v25 = vld [vmem:[#allocation6 + $0x260] ss:$16 sps:$4 sm:$0xff]   ;;  %v1587_v43 = vld [vmem:[#allocation6 + $0x104] ss:$16 sps:$4 sm:$0xff]  }
 0x140   :  { %v478_v22 = vadd.f32 %v477_v18, %v1875_v15  ;;  %v479_v19 = vsel %vm356_vm1, %v1879_v16, 0.0  ;;  %271 = vmatpush1.bf16.msra.mxu0 %v1389_v29  ;;  %v1549_v18 = vld [vmem:[#allocation6 + $0x1c0] ss:$16 sps:$4 sm:$0xff]  }
 0x141   :  { %1157 = vmatprep.subr.bf16.mxu0 %v1518_v32  ;;  %v1567_v29 = vld [vmem:[#allocation6 + $0x160] ss:$16 sps:$4 sm:$0xff]   ;;  %v1578_v32 = vld [vmem:[#allocation6 + $0x224] ss:$16 sps:$4 sm:$0xff]  }
 0x142   :  { %v480_v20 = vadd.f32 %v479_v19, %v478_v22  ;;  %v1557_v22 = vld [vmem:[#allocation6 + $0x1a4] ss:$16 sps:$4 sm:$0xff]   ;;  %v1585_v45 = vld [vmem:[#allocation6 + $0x100] ss:$16 sps:$4 sm:$0xff]  }
 0x143   :  { %1403 = vmatmul.mubr.msk.bf16.vlgmr.msra.gmra.mxu0 %vm170_vm0, %v1808_v17  ;;  %v1536_v17 = vld [vmem:[#allocation6 + $0x24] ss:$16 sps:$4 sm:$0xff]  }
 0x144   :  { %481 = vadd.xlane.f32.xlu0 %v480_v20  ;;  %1158 = vmatpush1.bf16.msra.mxu0 %v1516_v41  ;;  %v1560_v19 = vld [vmem:[#allocation6 + $0x284] ss:$16 sps:$4 sm:$0xff]   ;;  %v1555_v20 = vld [vmem:[#allocation6 + $0x1a0] ss:$16 sps:$4 sm:$0xff]  }
 0x145   :  { %1159 = vmatprep.subr.bf16.mxu0 %v1521_v44  ;;  %v1582_v41 = vld [vmem:[#allocation6 + $0x200] ss:$16 sps:$4 sm:$0xff]   ;;  %v1590_v44 = vld [vmem:[#allocation6 + $0x304] ss:$16 sps:$4 sm:$0xff]  }
 0x148   :  { %1160 = vmatpush1.bf16.msra.mxu0 %v1519_v46  ;;  %v1588_v46 = vld [vmem:[#allocation6 + $0x300] ss:$16 sps:$4 sm:$0xff]  }
 0x149   :  { %1161 = vmatprep.subr.bf16.mxu0 %v1524_v49  ;;  %v1596_v49 = vld [vmem:[#allocation6 + $0x2ec] ss:$16 sps:$4 sm:$0xff]  }
 0x14c   :  { %1162 = vmatpush1.bf16.msra.mxu0 %v1522_v54 }
 0x14d   :  { %1163 = vmatprep.subr.bf16.mxu0 %v1527_v56 }
 0x150   :  { %1164 = vmatpush1.bf16.msra.mxu0 %v1525_v57 }
 0x151   :  { %1165 = vmatprep.subr.bf16.mxu0 %v1530_v59 }
 0x154   :  { %1166 = vmatpush1.bf16.msra.mxu0 %v1528_v60 }
 0x155   :  { %1167 = vmatprep.subr.bf16.mxu0 %v1533_v61 }
 0x158   :  { %1168 = vmatpush1.bf16.msra.mxu0 %v1531_v62 }
 0x159   :  { %1169 = vmatprep.subr.bf16.mxu0 %v1536_v17 }
 0x15c   :  { %1170 = vmatpush1.bf16.msra.mxu0 %v1534_v63 }
 0x15d   :  { %1171 = vmatprep.subr.bf16.mxu0 %v1539_v48  ;;  %v508_v48 = vsub.s32 2, %v1846_v39 }
 0x160   :  { %1172 = vmatpush1.bf16.msra.mxu0 %v1537_v0  ;;  %v528_v0 = vsub.s32 3, %v1846_v39 }
 0x161   :  { %1173 = vmatprep.subr.bf16.mxu0 %v1545_v1  ;;  %v513_v1 = vrot.slane %v1850_v42, %v508_v48 }
 0x164   :  { %1174 = vmatpush2.bf16.msra.mxu0 %v1543_v2  ;;  %v521_v2 = vrot.slane %v1856_v52, %v508_v48 }
 0x165   :  { %1175 = vmatprep.subr.bf16.mxu0 %v1551_v14 }
 0x168   :  { %1176 = vmatpush2.bf16.msra.mxu0 %v1549_v18 }
 0x169   :  { %1177 = vmatprep.subr.bf16.mxu0 %v1557_v22 }
 0x16c   :  { %1178 = vmatpush2.bf16.msra.mxu0 %v1555_v20 }
 0x16d   :  { %1179 = vmatprep.subr.bf16.mxu0 %v1563_v23 }
 0x170   :  { %1180 = vmatpush2.bf16.msra.mxu0 %v1561_v26 }
 0x171   :  { %1181 = vmatprep.subr.bf16.mxu0 %v1569_v27 }
 0x174   :  { %1182 = vmatpush2.bf16.msra.mxu0 %v1567_v29  ;;  %v1591_v29 = vld [vmem:[#allocation6 + $0xe8] ss:$16 sps:$4 sm:$0xff]  }
 0x175   :  { %1183 = vmatprep.subr.bf16.mxu0 %v1575_v31  ;;  %v1602_v31 = vld [vmem:[#allocation6 + $0x2cc] ss:$16 sps:$4 sm:$0xff]  }
 0x178   :  { %1184 = vmatpush2.bf16.msra.mxu0 %v1573_v33  ;;  %v1600_v33 = vld [vmem:[#allocation6 + $0x2c8] ss:$16 sps:$4 sm:$0xff]  }
 0x179   :  { %1185 = vmatprep.subr.bf16.mxu0 %v1581_v35  ;;  %v1608_v35 = vld [vmem:[#allocation6 + $0x2ac] ss:$16 sps:$4 sm:$0xff]  }
 0x17c   :  { %1186 = vmatpush2.bf16.msra.mxu0 %v1579_v37  ;;  %v1606_v37 = vld [vmem:[#allocation6 + $0x2a8] ss:$16 sps:$4 sm:$0xff]  }
 0x17d   :  { %1187 = vmatprep.subr.bf16.mxu0 %v1587_v43  ;;  %v1614_v43 = vld [vmem:[#allocation6 + $0x28c] ss:$16 sps:$4 sm:$0xff]  }
 0x180   :  { %1188 = vmatpush2.bf16.msra.mxu0 %v1585_v45  ;;  %v1612_v45 = vld [vmem:[#allocation6 + $0x288] ss:$16 sps:$4 sm:$0xff]  }
 0x181   :  { %1280 = vmatprep.subr.bf16.mxu0 %v1596_v49  ;;  %v1615_v49 = vld [vmem:[#allocation6 + $0x68] ss:$16 sps:$4 sm:$0xff]  }
 0x1cd   :  { %v482_v3 = vpop.xlane.xlu0 %481 }
 0x1ce   :  { %v484_v51 = vmul.f32 0.0025, %v482_v3  ;;  %v509_v3 = vrot.slane %v1844_v38, %v508_v48 }
 0x1d0   :  { %v1889_v4 = vsub.f32 %v1870_v12, %v484_v51  ;;  %v1892_v5 = vsub.f32 %v1872_v58, %v484_v51  ;;  %v1895_v53 = vsub.f32 %v1875_v15, %v484_v51  ;;  %v1898_v6 = vsub.f32 %v1879_v16, %v484_v51  ;;  %v1554_v15 = vld [vmem:[#allocation6 + $0x2a4] ss:$16 sps:$4 sm:$0xff]   ;;  %v1552_v16 = vld [vmem:[#allocation6 + $0x2a0] ss:$16 sps:$4 sm:$0xff]  }
 0x1d1   :  { %1202 = vmatprep.subr.bf16.mxu1 %v1554_v15  ;;  %v517_v51 = vrot.slane %v1848_v40, %v508_v48  ;;  %v1627_v48 = vld [vmem:[#allocation6 + $0x28] ss:$16 sps:$4 sm:$0xff]  }
 0x1d2   :  { %v489_v7 = vmul.f32 %v1889_v4, %v1889_v4  ;;  %v490_v8 = vmul.f32 %v1892_v5, %v1892_v5  ;;  %v492_v9 = vmul.f32 %v1898_v6, %v1898_v6  ;;  %v491_v10 = vmul.f32 %v1895_v53, %v1895_v53  ;;  %1203 = vmatpush1.bf16.msra.mxu1 %v1552_v16 }
 0x1d3   :  { %1204 = vmatprep.subr.bf16.mxu1 %v1560_v19 }
 0x1d4   :  { %v493_v11 = vadd.f32 %v490_v8, %v489_v7  ;;  %v495_v58 = vsel %vm356_vm1, %v492_v9, 0.0  ;;  %v533_v8 = vrot.slane %v1850_v42, %v528_v0  ;;  %v541_v9 = vrot.slane %v1856_v52, %v528_v0 }
 0x1d6   :  { %v494_v12 = vadd.f32 %v493_v11, %v491_v10  ;;  %1205 = vmatpush1.bf16.msra.mxu1 %v1558_v21  ;;  %v529_v10 = vrot.slane %v1844_v38, %v528_v0  ;;  %v537_v11 = vrot.slane %v1848_v40, %v528_v0  ;;  %v1630_v0 = vld [vmem:[#allocation6 + $0x228] ss:$16 sps:$4 sm:$0xff]  }
 0x1d7   :  { %1206 = vmatprep.subr.bf16.mxu1 %v1566_v24 }
 0x1d8   :  { %v496_v13 = vadd.f32 %v495_v58, %v494_v12 }
 0x1da   :  { %497 = vadd.xlane.f32.xlu0 %v496_v13  ;;  %1207 = vmatpush1.bf16.msra.mxu1 %v1564_v25 }
 0x1db   :  { %1208 = vmatprep.subr.bf16.mxu1 %v1572_v28 }
 0x1de   :  { %1209 = vmatpush1.bf16.msra.mxu1 %v1570_v30 }
 0x1df   :  { %1210 = vmatprep.subr.bf16.mxu1 %v1578_v32  ;;  %v1597_v32 = vld [vmem:[#allocation6 + $0xc8] ss:$16 sps:$4 sm:$0xff]  }
 0x1e2   :  { %1211 = vmatpush1.bf16.msra.mxu1 %v1576_v34  ;;  %v1605_v34 = vld [vmem:[#allocation6 + $0xac] ss:$16 sps:$4 sm:$0xff]  }
 0x1e3   :  { %1212 = vmatprep.subr.bf16.mxu1 %v1584_v36  ;;  %v1603_v36 = vld [vmem:[#allocation6 + $0xa8] ss:$16 sps:$4 sm:$0xff]  }
 0x1e6   :  { %1213 = vmatpush1.bf16.msra.mxu1 %v1582_v41  ;;  %v1611_v41 = vld [vmem:[#allocation6 + $0x8c] ss:$16 sps:$4 sm:$0xff]  }
 0x1e7   :  { %1228 = vmatprep.subr.bf16.mxu1 %v1590_v44  ;;  %v1609_v44 = vld [vmem:[#allocation6 + $0x88] ss:$16 sps:$4 sm:$0xff]  }
 0x1ea   :  { %1229 = vmatpush2.bf16.msra.mxu1 %v1588_v46  ;;  %v1617_v46 = vld [vmem:[#allocation6 + $0x6c] ss:$16 sps:$4 sm:$0xff]  }
 0x1eb   :  { %1239 = vmatprep.subr.bf16.mxu1 %v1593_v47  ;;  %v1620_v47 = vld [vmem:[#allocation6 + $0x26c] ss:$16 sps:$4 sm:$0xff]  }
 0x1f6   :  { %v1909_v50 = vpop.f32.mrf.mxu1 }
 0x1f8   :  { %v1913_v55 = vpop.f32.mrf.mxu1 }
 0x1fa   :  { %v335_v57 = vpop.f32.mrf.mxu1 }
 0x1fb   :  { %v1618_v57 = vld [vmem:[#allocation6 + $0x268] ss:$16 sps:$4 sm:$0xff]  }
 0x1fc   :  { %v336_v60 = vpop.f32.mrf.mxu1 }
 0x1fd   :  { %v1626_v60 = vld [vmem:[#allocation6 + $0x24c] ss:$16 sps:$4 sm:$0xff]  }
 0x203   :  { %v1911_v54 = vpop.f32.mrf.mxu0 }
 0x205   :  { %v1915_v56 = vpop.f32.mrf.mxu0 }
 0x207   :  { %v294_v59 = vpop.f32.mrf.mxu0 }
 0x208   :  { %v1623_v59 = vld [vmem:[#allocation6 + $0x4c] ss:$16 sps:$4 sm:$0xff]  }
 0x209   :  { %v295_v61 = vpop.f32.mrf.mxu0 }
 0x20a   :  { %v1621_v61 = vld [vmem:[#allocation6 + $0x48] ss:$16 sps:$4 sm:$0xff]  }
 0x263   :  { %v498_v62 = vpop.xlane.xlu0 %497 }
 0x264   :  { %v499_v17 = vmul.f32 0.0025, %v498_v62  ;;  %v1624_v62 = vld [vmem:[#allocation6 + $0x248] ss:$16 sps:$4 sm:$0xff]  }
 0x266   :  { %v500_v63 = vadd.f32 1e-05, %v499_v17  ;;  %v1629_v17 = vld [vmem:[#allocation6 + $0x2c] ss:$16 sps:$4 sm:$0xff]  }
 0x268   :  { %1674 = vrsqrt.f32 %v500_v63  ;;  %v1632_v63 = vld [vmem:[#allocation6 + $0x22c] ss:$16 sps:$4 sm:$0xff]  }
 0x275   :  { %v1675_v7 = vpop.eup %1674 }
 0x276   :  { %v503_v12 = vmul.f32 %v1675_v7, %v1892_v5  ;;  %v505_v58 = vmul.f32 %v1675_v7, %v1898_v6  ;;  %v502_v13 = vmul.f32 %v1675_v7, %v1889_v4  ;;  %v504_v14 = vmul.f32 %v1675_v7, %v1895_v53  ;;  %v1594_v6 = vld [vmem:[#allocation6 + $0x2e8] ss:$16 sps:$4 sm:$0xff]   ;;  %v1599_v53 = vld [vmem:[#allocation6 + $0xcc] ss:$16 sps:$4 sm:$0xff]  }
 0x277   :  { %v1641_v7 = vld [vmem:[#allocation6 + $0x1ec] ss:$16 sps:$4 sm:$0xff]  }
 0x278   :  { %v523_v15 = vmul.f32 %v513_v1, %v503_v12  ;;  %v525_v18 = vmul.f32 %v521_v2, %v505_v58  ;;  %v522_v16 = vmul.f32 %v509_v3, %v502_v13  ;;  %v524_v22 = vmul.f32 %v517_v51, %v504_v14  ;;  %v1635_v1 = vld [vmem:[#allocation6 + $0xc] ss:$16 sps:$4 sm:$0xff]   ;;  %v1633_v3 = vld [vmem:[#allocation6 + $0x8] ss:$16 sps:$4 sm:$0xff]  }
 0x279   :  { %v1638_v2 = vld [vmem:[#allocation6 + $0x20c] ss:$16 sps:$4 sm:$0xff]   ;;  %v1636_v51 = vld [vmem:[#allocation6 + $0x208] ss:$16 sps:$4 sm:$0xff]  }
 0x27a   :  { %v543_v19 = vadd.f32 %v533_v8, %v523_v15  ;;  %v545_v20 = vadd.f32 %v541_v9, %v525_v18  ;;  %v542_v21 = vadd.f32 %v529_v10, %v522_v16  ;;  %v544_v23 = vadd.f32 %v537_v11, %v524_v22  ;;  %v1644_v8 = vld [vmem:[#allocation6 + $0x30c] ss:$16 sps:$4 sm:$0xff]   ;;  %v1639_v9 = vld [vmem:[#allocation6 + $0x1e8] ss:$16 sps:$4 sm:$0xff]  }
 0x27b   :  { %v1642_v10 = vld [vmem:[#allocation6 + $0x308] ss:$16 sps:$4 sm:$0xff]   ;;  %v1647_v11 = vld [vmem:[#allocation6 + $0x1cc] ss:$16 sps:$4 sm:$0xff]  }
 0x27c   :  { %v547_v24 = vmax.f32 %v543_v19, 0.0  ;;  %v549_v26 = vmax.f32 %v545_v20, 0.0  ;;  %v546_v25 = vmax.f32 %v542_v21, 0.0  ;;  %v548_v27 = vmax.f32 %v544_v23, 0.0  ;;  %v1645_v12 = vld [vmem:[#allocation6 + $0x1c8] ss:$16 sps:$4 sm:$0xff]  }
 0x27d   :  { %v1650_v58 = vld [vmem:[#allocation6 + $0x1ac] ss:$16 sps:$4 sm:$0xff]   ;;  %v1648_v13 = vld [vmem:[#allocation6 + $0x1a8] ss:$16 sps:$4 sm:$0xff]  }
 0x27e   :  { %v551_v28 = vpack.c.bf16 %v547_v24, %v547_v24  ;;  %v553_v5 = vpack.c.bf16 %v549_v26, %v549_v26  ;;  %v1931_v30 = vpack.c.bf16 %v546_v25, %v546_v25  ;;  %v1933_v4 = vpack.c.bf16 %v548_v27, %v548_v27  ;;  %v1653_v14 = vld [vmem:[#allocation6 + $0x18c] ss:$16 sps:$4 sm:$0xff]   ;;  %v1651_v15 = vld [vmem:[#allocation6 + $0x188] ss:$16 sps:$4 sm:$0xff]  }
 0x27f   :  { %v1656_v18 = vld [vmem:[#allocation6 + $0x16c] ss:$16 sps:$4 sm:$0xff]   ;;  %v1654_v16 = vld [vmem:[#allocation6 + $0x168] ss:$16 sps:$4 sm:$0xff]  }
 0x280   :  { %1189 = vmatprep.mubr.bf16.mxu0 %v551_v28  ;;  %1505 = vmatprep.mubr.msk.bf16.mxu1 %vm356_vm1, %v553_v5  ;;  %v1659_v22 = vld [vmem:[#allocation6 + $0x14c] ss:$16 sps:$4 sm:$0xff]   ;;  %v1657_v19 = vld [vmem:[#allocation6 + $0x148] ss:$16 sps:$4 sm:$0xff]  }
 0x281   :  { %1190 = vmatmul.mubr.bf16.vlgmr.msra.gmra.mxu0 %v1931_v30  ;;  %1231 = vmatmul.mubr.bf16.vlgmr.msra.gmra.mxu1 %v1933_v4  ;;  %v1662_v20 = vld [vmem:[#allocation6 + $0x12c] ss:$16 sps:$4 sm:$0xff]   ;;  %v1660_v21 = vld [vmem:[#allocation6 + $0x128] ss:$16 sps:$4 sm:$0xff]  }
 0x282   :  { %1240 = vmatpush1.bf16.msra.mxu1 %v1591_v29  ;;  %1281 = vmatpush1.bf16.msra.mxu0 %v1594_v6  ;;  %v1665_v23 = vld [vmem:[#allocation6 + $0x10c] ss:$16 sps:$4 sm:$0xff]   ;;  %v1663_v24 = vld [vmem:[#allocation6 + $0x108] ss:$16 sps:$4 sm:$0xff]  }
 0x283   :  { %1271 = vmatprep.mubr.bf16.mxu1 %v551_v28  ;;  %1506 = vmatprep.mubr.msk.bf16.mxu0 %vm356_vm1, %v553_v5 }
 0x284   :  { %1241 = vmatprep.subr.bf16.mxu1 %v1599_v53  ;;  %1282 = vmatprep.subr.bf16.mxu0 %v1602_v31 }
 0x286   :  { %1242 = vmatpush1.bf16.msra.mxu1 %v1597_v32  ;;  %1283 = vmatpush1.bf16.msra.mxu0 %v1600_v33 }
 0x287   :  { %1243 = vmatprep.subr.bf16.mxu1 %v1605_v34  ;;  %1284 = vmatprep.subr.bf16.mxu0 %v1608_v35 }
 0x28a   :  { %1244 = vmatpush1.bf16.msra.mxu1 %v1603_v36  ;;  %1285 = vmatpush1.bf16.msra.mxu0 %v1606_v37  ;;  %v1323_v36 = vsub.s32 4, %v1846_v39 }
 0x28b   :  { %1245 = vmatprep.subr.bf16.mxu1 %v1611_v41  ;;  %1286 = vmatprep.subr.bf16.mxu0 %v1614_v43 }
 0x28c   :  { %v1324_v43 = vrot.slane %v1844_v38, %v1323_v36 }
 0x28e   :  { %1246 = vmatpush1.bf16.msra.mxu1 %v1609_v44  ;;  %1287 = vmatpush1.bf16.msra.mxu0 %v1612_v45  ;;  %v1347_v45 = vsub.s32 5, %v1846_v39 }
 0x28f   :  { %1247 = vmatprep.subr.bf16.mxu1 %v1617_v46  ;;  %1288 = vmatprep.subr.bf16.mxu0 %v1620_v47 }
 0x292   :  { %1248 = vmatpush1.bf16.msra.mxu1 %v1615_v49  ;;  %1289 = vmatpush1.bf16.msra.mxu0 %v1618_v57  ;;  %v1352_v57 = vrot.slane %v1850_v42, %v1347_v45 }
 0x293   :  { %1249 = vmatprep.subr.bf16.mxu1 %v1623_v59  ;;  %1290 = vmatprep.subr.bf16.mxu0 %v1626_v60  ;;  %v1348_v59 = vrot.slane %v1844_v38, %v1347_v45 }
 0x296   :  { %1250 = vmatpush1.bf16.msra.mxu1 %v1621_v61  ;;  %1291 = vmatpush1.bf16.msra.mxu0 %v1624_v62 }
 0x297   :  { %1251 = vmatprep.subr.bf16.mxu1 %v1629_v17  ;;  %1292 = vmatprep.subr.bf16.mxu0 %v1632_v63  ;;  %v1336_v63 = vrot.slane %v1856_v52, %v1323_v36 }
 0x29a   :  { %1252 = vmatpush1.bf16.msra.mxu1 %v1627_v48  ;;  %1293 = vmatpush1.bf16.msra.mxu0 %v1630_v0 }
 0x29b   :  { %1253 = vmatprep.subr.bf16.mxu1 %v1635_v1  ;;  %1294 = vmatprep.subr.bf16.mxu0 %v1638_v2 }
 0x29e   :  { %1254 = vmatpush1.bf16.msra.mxu1 %v1633_v3  ;;  %1295 = vmatpush1.bf16.msra.mxu0 %v1636_v51  ;;  %v1356_v3 = vrot.slane %v1848_v40, %v1347_v45 }
 0x29f   :  { %1255 = vmatprep.subr.bf16.mxu1 %v1641_v7  ;;  %1310 = vmatprep.subr.bf16.mxu0 %v1644_v8  ;;  %v1360_v8 = vrot.slane %v1856_v52, %v1347_v45 }
 0x2a2   :  { %1256 = vmatpush2.bf16.msra.mxu1 %v1639_v9  ;;  %1311 = vmatpush2.bf16.msra.mxu0 %v1642_v10 }
 0x2a3   :  { %1257 = vmatprep.subr.bf16.mxu1 %v1647_v11 }
 0x2a5   :  { %1313 = vmatmul.mubr.bf16.vlgmr.msra.gmra.mxu0 %v1933_v4 }
 0x2a6   :  { %1258 = vmatpush2.bf16.msra.mxu1 %v1645_v12 }
 0x2a7   :  { %1259 = vmatprep.subr.bf16.mxu1 %v1650_v58 }
 0x2aa   :  { %1260 = vmatpush2.bf16.msra.mxu1 %v1648_v13 }
 0x2ab   :  { %1261 = vmatprep.subr.bf16.mxu1 %v1653_v14  ;;  %v1373_v14 = vsub.s32 6, %v1846_v39 }
 0x2ae   :  { %1262 = vmatpush2.bf16.msra.mxu1 %v1651_v15  ;;  %v1374_v15 = vrot.slane %v1844_v38, %v1373_v14 }
 0x2af   :  { %1263 = vmatprep.subr.bf16.mxu1 %v1656_v18 }
 0x2b2   :  { %1264 = vmatpush2.bf16.msra.mxu1 %v1654_v16 }
 0x2b3   :  { %1265 = vmatprep.subr.bf16.mxu1 %v1659_v22 }
 0x2b6   :  { %1266 = vmatpush2.bf16.msra.mxu1 %v1657_v19 }
 0x2b7   :  { %1267 = vmatprep.subr.bf16.mxu1 %v1662_v20 }
 0x2ba   :  { %1268 = vmatpush2.bf16.msra.mxu1 %v1660_v21 }
 0x2bb   :  { %1269 = vmatprep.subr.bf16.mxu1 %v1665_v23 }
 0x2be   :  { %1270 = vmatpush2.bf16.msra.mxu1 %v1663_v24 }
 0x2c1   :  { %1272 = vmatmul.mubr.bf16.vlgmr.msra.gmra.mxu1 %v1931_v30  ;;  %v1328_v30 = vrot.slane %v1850_v42, %v1323_v36 }
 0x341   :  { %v1191_v26 = vpop.f32.mrf.mxu0  ;;  %v1232_v25 = vpop.f32.mrf.mxu1 }
 0x342   :  { %v1192_v35 = vadd.f32 %v1191_v26, %v1911_v54  ;;  %v1332_v54 = vrot.slane %v1848_v40, %v1323_v36 }
 0x343   :  { %v1193_v27 = vpop.f32.mrf.mxu0  ;;  %v1234_v28 = vpop.f32.mrf.mxu1 }
 0x344   :  { %v1194_v34 = vadd.f32 %v1193_v27, %v1915_v56  ;;  %v1233_v41 = vadd.f32 %v1232_v25, %v1192_v35 }
 0x345   :  { %v1195_v5 = vpop.f32.mrf.mxu0  ;;  %v1236_v29 = vpop.f32.mrf.mxu1 }
 0x346   :  { %v1235_v37 = vadd.f32 %v1234_v28, %v1194_v34  ;;  %v1337_v46 = vadd.f32 %v1324_v43, %v1233_v41 }
 0x347   :  { %v1196_v6 = vpop.f32.mrf.mxu0  ;;  %v1237_v4 = vpop.f32.mrf.mxu1 }
 0x348   :  { %v1338_v44 = vadd.f32 %v1328_v30, %v1235_v37  ;;  %v1341_v61 = vmax.f32 %v1337_v46, 0.0 }
 0x34a   :  { %v1342_v49 = vmax.f32 %v1338_v44, 0.0  ;;  %v1361_v51 = vmul.f32 %v1348_v59, %v1341_v61 }
 0x34c   :  { %v1362_v0 = vmul.f32 %v1352_v57, %v1342_v49 }
 0x34e   :  { %v1365_v11 = vadd.f32 %v1362_v0, %v1361_v51 }
 0x365   :  { %v1314_v53 = vpop.f32.mrf.mxu0 }
 0x367   :  { %v1316_v31 = vpop.f32.mrf.mxu0 }
 0x369   :  { %v1318_v32 = vpop.f32.mrf.mxu0 }
 0x36b   :  { %v1319_v33 = vpop.f32.mrf.mxu0 }
 0x381   :  { %v1273_v47 = vpop.f32.mrf.mxu1 }
 0x382   :  { %v1274_v56 = vadd.f32 %v1273_v47, %v1909_v50 }
 0x383   :  { %v1275_v60 = vpop.f32.mrf.mxu1 }
 0x384   :  { %v1315_v62 = vadd.f32 %v1314_v53, %v1274_v56  ;;  %v1276_v17 = vadd.f32 %v1275_v60, %v1913_v55 }
 0x385   :  { %v1277_v48 = vpop.f32.mrf.mxu1 }
 0x386   :  { %v1339_v1 = vadd.f32 %v1332_v54, %v1315_v62  ;;  %v1317_v2 = vadd.f32 %v1316_v31, %v1276_v17 }
 0x387   :  { %v1278_v42 = vpop.f32.mrf.mxu1 }
 0x388   :  { %v1343_v50 = vmax.f32 %v1339_v1, 0.0  ;;  %v1340_v7 = vadd.f32 %v1336_v63, %v1317_v2 }
 0x38a   :  { %v1344_v9 = vmax.f32 %v1340_v7, 0.0  ;;  %v1363_v10 = vmul.f32 %v1356_v3, %v1343_v50 }
 0x38c   :  { %v1364_v12 = vmul.f32 %v1360_v8, %v1344_v9  ;;  %v1366_v58 = vadd.f32 %v1365_v11, %v1363_v10 }
 0x38e   :  { %v1367_v55 = vsel %vm356_vm1, %v1364_v12, 0.0 }
 0x38f   :  { %v1368_v13 = vadd.f32 %v1367_v55, %v1366_v58 }
 0x391   :  { %1369 = vadd.xlane.f32.xlu1 %v1368_v13 }
 0x41a   :  { %v1370_v40 = vpop.xlane.xlu1 %1369 }
 0x41b   :  { %v1375_v18 = vadd.f32 %v1374_v15, %v1370_v40 }
 0x41d   :  { %1377 = vst.msk [vmem:[%s1965_s4] sm:$0xff] %vm1376_vm2, %v1375_v18 }
 0x41e   :  { %1382 = vsyncpa [#allocation3], 1 }
 0x41f   :  { %1383 = vsyncpa [#allocation5], 1 }
 0x420   :  { %1384 = vsyncpa [#allocation8], 1 }

</bundles_post_ra>
